<compile_context>
chip_gen: v5e
topology: v5e:2x2
jax: 0.10.0
libtpu: 0.0.40
codegen_flags: <defaults>
</compile_context>

<pallas_src>
import jax
import jax.numpy as jnp
from jax.experimental import pallas as pl
from jax.experimental.pallas import tpu as pltpu

_LANE_W = 1024     # lane-dense last dim: large multiple of 128 -> unmasked stores
_MAX_TILE_R = 512  # 512 x 1024 f32 block = 2 MiB; x3 arrays x2 bufs = 12 MiB live


def _hinge_kernel(out_ref, tgt_ref, loss_ref):
    # max(0, 1 - output * target); scalar constants keep the ref dtype (bf16 stays bf16).
    loss_ref[...] = jnp.maximum(1 - out_ref[...] * tgt_ref[...], 0)


def _round_up(x, m):
    return ((x + m - 1) // m) * m


def hinge_loss(output, target):
    assert output.shape == target.shape, "output/target must have identical shapes"
    orig_shape = output.shape
    dtype = output.dtype

    n = 1
    for d in orig_shape:
        n *= int(d)

    # Sublane multiple for the dtype tiling constraint (f32: 8, bf16: 16, int8: 32).
    itemsize = jnp.dtype(dtype).itemsize
    sub = 8 * max(1, 4 // itemsize)

    # Pad to a lane-dense slab whose row count is an exact multiple of the tile.
    rows_needed = _round_up(n, _LANE_W) // _LANE_W
    tile_r = min(_MAX_TILE_R, _round_up(rows_needed, sub))
    rows_padded = _round_up(rows_needed, tile_r)
    padded_n = rows_padded * _LANE_W

    flat_o = output.reshape(-1)
    flat_t = target.reshape(-1)
    if padded_n != n:
        pad = padded_n - n
        flat_o = jnp.pad(flat_o, (0, pad))
        flat_t = jnp.pad(flat_t, (0, pad))

    o2 = flat_o.reshape(rows_padded, _LANE_W)
    t2 = flat_t.reshape(rows_padded, _LANE_W)

    grid = (rows_padded // tile_r,)
    block = (tile_r, _LANE_W)

    result = pl.pallas_call(
        _hinge_kernel,
        out_shape=jax.ShapeDtypeStruct((rows_padded, _LANE_W), dtype),
        grid=grid,
        in_specs=[
            pl.BlockSpec(block, lambda i: (i, 0)),
            pl.BlockSpec(block, lambda i: (i, 0)),
        ],
        out_specs=pl.BlockSpec(block, lambda i: (i, 0)),
        compiler_params=pltpu.CompilerParams(
            dimension_semantics=("parallel",),
        ),
    )(o2, t2)

    return result.reshape(-1)[:n].reshape(orig_shape)


if __name__ == "__main__":
    key = jax.random.PRNGKey(0)
    k1, k2 = jax.random.split(key)

    # Small shapes: batch=2, channels=4, spatial=16x16
    shape = (2, 4, 16, 16)
    output = jax.random.normal(k1, shape, dtype=jnp.float32)
    # targets in {-1, +1} like a typical hinge-loss setup
    target = jnp.sign(jax.random.normal(k2, shape, dtype=jnp.float32))
    target = jnp.where(target == 0, 1.0, target)

    loss = hinge_loss(output, target)
    jax.block_until_ready(loss)

    # Reference check against plain JAX
    ref = jnp.maximum(1.0 - output * target, 0.0)
    assert loss.shape == shape
    assert jnp.allclose(loss, ref, atol=1e-6), "mismatch vs reference"

    print("KERNEL_OK")
</pallas_src>

<mosaic_0001>
module attributes {stable_mosaic.version = 11 : i64} {
  func.func @_hinge_kernel(%arg0: i32, %arg1: memref<8x1024xf32, #tpu.memory_space<vmem>>, %arg2: memref<8x1024xf32, #tpu.memory_space<vmem>>, %arg3: memref<8x1024xf32, #tpu.memory_space<vmem>>) attributes {dimension_semantics = [#tpu.dimension_semantics<parallel>], iteration_bounds = array<i64: 1>, scalar_prefetch = 0 : i64, scratch_operands = 0 : i64, tpu.core_type = #tpu.core_type<tc>, window_params = [{transform_indices = @transform_0, window_bounds = array<i64: 8, 1024>}, {transform_indices = @transform_1, window_bounds = array<i64: 8, 1024>}, {transform_indices = @transform_2, window_bounds = array<i64: 8, 1024>}]} {
    %c0 = arith.constant 0 : index
    %c0_0 = arith.constant 0 : index
    %0 = vector.load %arg1[%c0, %c0_0] : memref<8x1024xf32, #tpu.memory_space<vmem>>, vector<8x1024xf32>
    %c0_1 = arith.constant 0 : index
    %c0_2 = arith.constant 0 : index
    %1 = vector.load %arg2[%c0_1, %c0_2] : memref<8x1024xf32, #tpu.memory_space<vmem>>, vector<8x1024xf32>
    %2 = arith.mulf %0, %1 : vector<8x1024xf32>
    %cst = arith.constant 1.000000e+00 : f32
    %3 = vector.broadcast %cst : f32 to vector<8x1024xf32>
    %4 = arith.subf %3, %2 : vector<8x1024xf32>
    %cst_3 = arith.constant 0.000000e+00 : f32
    %5 = vector.broadcast %cst_3 : f32 to vector<8x1024xf32>
    %6 = arith.maximumf %4, %5 : vector<8x1024xf32>
    %c0_4 = arith.constant 0 : index
    %c0_5 = arith.constant 0 : index
    %7 = vector.load %arg3[%c0_4, %c0_5] : memref<8x1024xf32, #tpu.memory_space<vmem>>, vector<8x1024xf32>
    tpu.vector_store %arg3[%c0_4, %c0_5], %6 {strides = array<i32>} : memref<8x1024xf32, #tpu.memory_space<vmem>>, vector<8x1024xf32>,
    return
  }
  func.func @transform_0(%arg0: i32) -> (i32, i32) {
    %c0_i32 = arith.constant 0 : i32
    %c0_i32_0 = arith.constant 0 : i32
    return %arg0, %c0_i32 : i32, i32
  }
  func.func @transform_1(%arg0: i32) -> (i32, i32) {
    %c0_i32 = arith.constant 0 : i32
    %c0_i32_0 = arith.constant 0 : i32
    return %arg0, %c0_i32 : i32, i32
  }
  func.func @transform_2(%arg0: i32) -> (i32, i32) {
    %c0_i32 = arith.constant 0 : i32
    %c0_i32_0 = arith.constant 0 : i32
    return %arg0, %c0_i32 : i32, i32
  }
}

</mosaic_0001>

<bundles_post_ra>
// kernel: tpu_custom_call.1
= control target key start
LH: loop header
LB: loop body
LE: loop exit
PB: predicated region body
PF: predicated region fallthrough
CT: control target
= control target key end

     0   :  { %7 = vsyncpa [#allocation3], 0  ;;  %s214_s0 = inlined_call_operand.hbm [shape: f32[8,1024], index: 0, kind: input, shape index: {}]   ;;  %s215_s1 = inlined_call_operand.hbm [shape: f32[8,1024], index: 1, kind: input, shape index: {}]   ;;  %s216_s2 = inlined_call_operand.hbm [shape: f32[8,1024], index: 2, kind: output, shape index: {}]  }
   0x1   :  { %8 = vsyncpa [#allocation6], 0 }
   0x2   :  { %9 = vsyncpa [#allocation4], 0  ;;  %s15_s11 = sshll.u32 %s214_s0, 4  ;;  %s187_s12 = smov [#allocation2]   ;;  %s16_s11 = int_to_ptr.hbm [resolvable:$true] %s15_s11 }
   0x3   :  { %s17_s13 = sshll.u32 %s187_s12, 4  ;;  %s26_s16 = sshll.u32 %s215_s1, 4  ;;  %s18_s13 = int_to_ptr.vmem [resolvable:$true] %s17_s13  ;;  %s27_s16 = int_to_ptr.hbm [resolvable:$true] %s26_s16 }
   0x4   :  { %20 = dma.hbm_to_vmem [thread:$0]  %s16_s11, 1024, %s18_s13, [#allocation3]  }
   0x5   :  { %s188_s17 = smov [#allocation5]  }
   0x6   :  { %s28_s18 = sshll.u32 %s188_s17, 4  ;;  %s29_s18 = int_to_ptr.vmem [resolvable:$true] %s28_s18 }
   0x7   :  { %31 = dma.hbm_to_vmem [thread:$0]  %s27_s16, 1024, %s29_s18, [#allocation6]  }
   0x8   :  { %181 = dma.done.wait [#allocation3], 1024  }
   0x9   :  { %182 = vsyncadd [#allocation3], 4294966272 }
   0xa   :  { %183 = dma.done.wait [#allocation6], 1024  }
   0xb   :  { %184 = vsyncadd [#allocation6], 4294966272  ;;  %v40_v0 = vld [vmem:[#allocation2] sm:$0xff]  ;;  %v41_v2 = vld [vmem:[#allocation2 + $0x8] sm:$0xff]  ;;  %s189_s0 = smov [#allocation7]   ;;  %s95_s21 = sshll.u32 %s216_s2, 4  ;;  %s96_s21 = int_to_ptr.hbm [resolvable:$true] %s95_s21 }
   0xc   :  { %v48_v1 = vld [vmem:[#allocation5] sm:$0xff]  ;;  %v49_v4 = vld [vmem:[#allocation5 + $0x8] sm:$0xff]  ;;  %v42_v5 = vld [vmem:[#allocation2 + $0x10] sm:$0xff]  ;;  %s93_s1 = sshll.u32 %s189_s0, 4  ;;  %s94_s1 = int_to_ptr.vmem [resolvable:$true] %s93_s1 }
   0xd   :  { %v56_v3 = vmul.f32 %v48_v1, %v40_v0  ;;  %v50_v6 = vld [vmem:[#allocation5 + $0x10] sm:$0xff]  ;;  %v57_v7 = vmul.f32 %v49_v4, %v41_v2  ;;  %v43_v9 = vld [vmem:[#allocation2 + $0x18] sm:$0xff]  ;;  %v44_v11 = vld [vmem:[#allocation2 + $0x20] sm:$0xff] }
   0xe   :  { %v58_v8 = vmul.f32 %v50_v6, %v42_v5  ;;  %v51_v10 = vld [vmem:[#allocation5 + $0x18] sm:$0xff]  ;;  %v52_v14 = vld [vmem:[#allocation5 + $0x20] sm:$0xff]  ;;  %v45_v15 = vld [vmem:[#allocation2 + $0x28] sm:$0xff] }
   0xf   :  { %v64_v12 = vsub.f32 1.0, %v56_v3  ;;  %v59_v13 = vmul.f32 %v51_v10, %v43_v9  ;;  %v53_v16 = vld [vmem:[#allocation5 + $0x28] sm:$0xff]  ;;  %v65_v17 = vsub.f32 1.0, %v57_v7  ;;  %v60_v19 = vmul.f32 %v52_v14, %v44_v11  ;;  %v46_v21 = vld [vmem:[#allocation2 + $0x30] sm:$0xff]  ;;  %v47_v23 = vld [vmem:[#allocation2 + $0x38] sm:$0xff] }
  0x10   :  { %v66_v18 = vsub.f32 1.0, %v58_v8  ;;  %v61_v20 = vmul.f32 %v53_v16, %v45_v15  ;;  %v54_v22 = vld [vmem:[#allocation5 + $0x30] sm:$0xff]  ;;  %v55_v27 = vld [vmem:[#allocation5 + $0x38] sm:$0xff] }
  0x11   :  { %v72_v24 = vmax.f32 %v64_v12, 0.0  ;;  %v67_v25 = vsub.f32 1.0, %v59_v13  ;;  %v62_v26 = vmul.f32 %v54_v22, %v46_v21  ;;  %v73_v28 = vmax.f32 %v65_v17, 0.0 }
  0x12   :  { %v74_v29 = vmax.f32 %v66_v18, 0.0  ;;  %v68_v30 = vsub.f32 1.0, %v60_v19  ;;  %v69_v31 = vsub.f32 1.0, %v61_v20  ;;  %v63_v34 = vmul.f32 %v55_v27, %v47_v23 }
  0x13   :  { %80 = vst [vmem:[#allocation7] sm:$0xff] %v72_v24  ;;  %v75_v32 = vmax.f32 %v67_v25, 0.0  ;;  %v70_v33 = vsub.f32 1.0, %v62_v26 }
  0x14   :  { %81 = vst [vmem:[#allocation7 + $0x8] sm:$0xff] %v73_v28  ;;  %v76_v35 = vmax.f32 %v68_v30, 0.0  ;;  %v77_v36 = vmax.f32 %v69_v31, 0.0  ;;  %v71_v38 = vsub.f32 1.0, %v63_v34 }
  0x15   :  { %82 = vst [vmem:[#allocation7 + $0x10] sm:$0xff] %v74_v29  ;;  %v78_v37 = vmax.f32 %v70_v33, 0.0 }
  0x16   :  { %83 = vst [vmem:[#allocation7 + $0x18] sm:$0xff] %v75_v32  ;;  %v79_v39 = vmax.f32 %v71_v38, 0.0 }
  0x17   :  { %84 = vst [vmem:[#allocation7 + $0x20] sm:$0xff] %v76_v35 }
  0x18   :  { %85 = vst [vmem:[#allocation7 + $0x28] sm:$0xff] %v77_v36 }
  0x19   :  { %86 = vst [vmem:[#allocation7 + $0x30] sm:$0xff] %v78_v37 }
  0x1a   :  { %87 = vst [vmem:[#allocation7 + $0x38] sm:$0xff] %v79_v39 }
  0x1b   :  { %98 = dma.vmem_to_hbm [thread:$0]  %s94_s1, 1024, %s96_s21, [#allocation4]  }
  0x1c   :  { %185 = dma.done.wait [#allocation4], 1024  }
  0x1d   :  { %186 = vsyncadd [#allocation4], 4294966272 }
  0x1e   :  { %103 = vsyncpa [#allocation3], 1 }
  0x1f   :  { %104 = vsyncpa [#allocation6], 1 }
  0x20   :  { %105 = vsyncpa [#allocation4], 1 }

</bundles_post_ra>
